<compile_context>
chip_gen: v7x
topology: tpu7x:2x2x1
jax: 0.10.0
libtpu: 0.0.40
codegen_flags: <defaults>
</compile_context>

<pallas_src>
import functools

import jax
import jax.numpy as jnp
import numpy as np
from jax.experimental import pallas as pl
from jax.experimental.pallas import tpu as pltpu

# problem sizes (small, consistent with the forward semantics)
S, C, N, M = 8, 4, 16, 8          # likelihood samples, classes, data points, inducing pts
NUM_DATA, BETA = 100.0, 1.0

_OUT_ROWS = 8                     # output slab sublane count (one vreg tall)
_LANES = 128                      # lane width of the packed slabs


# ---------------------------------------------------------------------------
# Single fused kernel:
#   - logits = mean + eps_packed @ blockdiag(L^T)   (ONE MXU matmul)
#   - packed softmax / log-softmax (N*C on lanes, one exp pass)
#   - probs.mean(0), argmax(-1), max(-1)
#   - Categorical log_prob(y).mean(0).sum(-1) / N
#   - KL(q(u) || N(0, I)) summed over classes
#   - final ELBO combination; one unmasked lane-dense (8, 128) output store
# ---------------------------------------------------------------------------
def _fused_elbo_kernel(small_ref, mat_ref, out_ref, *,
                       n_samp, c_cls, n_pts, m_ind, chol_rows,
                       num_data, beta):
    cn = c_cls * n_pts
    cm = c_cls * m_ind

    # ---- packed inputs ------------------------------------------------------
    eps = mat_ref[0:n_samp, :]                 # [S, C*N]   lane = c*N + n
    ltb = mat_ref[n_samp:n_samp + cn, :]       # [C*N, C*N] block-diagonal L^T
    mean_row = small_ref[0:1, 0:cn]            # [1, C*N]
    y1h = small_ref[1:2, 0:cn]                 # [1, C*N]   packed one-hot(y)

    # ---- latent samples: ONE block-diagonal MXU matmul ------------------------
    logits = mean_row + jnp.dot(eps, ltb,
                                precision=jax.lax.Precision.HIGHEST,
                                preferred_element_type=jnp.float32)   # [S, C*N]

    def grp(x, c):                             # static 16-lane class-c group
        return x[:, c * n_pts:(c + 1) * n_pts]

    # ---- stable softmax / log-softmax on the packed plane ---------------------
    mx = grp(logits, 0)
    for c in range(1, c_cls):
        mx = jnp.maximum(mx, grp(logits, c))                    # [S, N]
    mx_tiled = jnp.concatenate([mx] * c_cls, axis=1)            # [S, C*N]
    shifted = logits - mx_tiled
    ex = jnp.exp(shifted)                                       # single EUP pass
    denom = grp(ex, 0)
    for c in range(1, c_cls):
        denom = denom + grp(ex, c)                              # [S, N]
    log_denom = jnp.log(denom)
    inv_denom = 1.0 / denom                    # exact divide (feeds argmax/y_out)

    # ---- probs.mean(0) -> max / first-argmax over classes ---------------------
    inv_s = jnp.float32(1.0 / n_samp)
    best_p = jnp.sum(grp(ex, 0) * inv_denom, axis=0, keepdims=True) * inv_s
    best_c = jnp.zeros_like(best_p)
    for c in range(1, c_cls):
        mp_c = jnp.sum(grp(ex, c) * inv_denom, axis=0, keepdims=True) * inv_s
        better = mp_c > best_p                 # strict '>' keeps first max (argmax)
        best_c = jnp.where(better, jnp.float32(c), best_c)
        best_p = jnp.where(better, mp_c, best_p)

    # ---- Categorical log_prob(y).mean(0).sum(-1) / event_shape[0] -------------
    # sum_c one_hot(y)[c, n] == 1, so the gathered log-prob total reduces to
    #   sum(shifted * one_hot) - sum(log_denom).
    ll_raw = jnp.sum(shifted * y1h) - jnp.sum(log_denom)
    log_likelihood = ll_raw * inv_s / jnp.float32(n_pts)

    # ---- KL( N(m, L L^T) || N(0, I) ) summed over classes ----------------------
    # TODO(synk): assumes strictly positive Cholesky diagonal and exactly
    # lower-triangular var_chol (same assumptions as the reference).
    vm = small_ref[2:3, 0:cm]                  # [1, C*M]  var_mean flat
    vd = small_ref[3:4, 0:cm]                  # [1, C*M]  Cholesky diagonal flat
    vc = small_ref[4:4 + chol_rows, :]         # [chol_rows, 128] var_chol, zero-padded
    trace_s = jnp.sum(vc * vc)                 # zero padding contributes nothing
    msq = jnp.sum(vm * vm)
    logdet = 2.0 * jnp.sum(jnp.log(vd))
    kl = 0.5 * (trace_s + msq - jnp.float32(cm) - logdet)
    kl_div = kl / jnp.float32(num_data / beta)

    loss = -(log_likelihood - kl_div)

    # ---- build the whole (8, 128) slab in registers, one unmasked store -------
    rows, lanes = out_ref.shape
    lane = jax.lax.broadcasted_iota(jnp.int32, (1, lanes), 1)
    row0 = jnp.where(lane == 0, loss,
                     jnp.where(lane == 1, log_likelihood,
                               jnp.where(lane == 2, kl_div, 0.0)))
    pad = jnp.zeros((1, lanes - n_pts), jnp.float32)
    row1 = jnp.concatenate([best_p, pad], axis=1)       # y_score
    row2 = jnp.concatenate([best_c, pad], axis=1)       # y_out (small ints as f32)
    tail = jnp.zeros((rows - 3, lanes), jnp.float32)
    out_ref[...] = jnp.concatenate([row0, row1, row2, tail], axis=0)


# ---------------------------------------------------------------------------
# Wrapper: pack everything into two lane-dense slabs, one pallas_call
# ---------------------------------------------------------------------------
def dice_bce_variational_elbo(mean, scale_tril, eps, y, var_mean, var_chol,
                              num_data=NUM_DATA, beta=BETA, combine_terms=True):
    c_cls, n_pts = mean.shape
    n_samp = eps.shape[0]
    m_ind = var_mean.shape[1]
    cn = c_cls * n_pts
    cm = c_cls * m_ind
    lanes = _LANES
    assert cn <= lanes and cm <= lanes and n_pts <= lanes, \
        "packed layout assumes C*N, C*M, N all fit in 128 lanes"

    f32 = jnp.float32

    # ---- slab B: packed eps stacked on the block-diagonal L^T  [S+CN, CN] ----
    eps_pack = eps.astype(f32).reshape(n_samp, cn)                 # lane = c*N + n
    lt_blkdiag = jax.scipy.linalg.block_diag(
        *[scale_tril[c].T.astype(f32) for c in range(c_cls)])      # [CN, CN]
    mat_slab = jnp.concatenate([eps_pack, lt_blkdiag], axis=0)     # [S+CN, CN]

    # ---- slab A: all the small operands in one lane-dense block [8, 128] -----
    def _row(v, fill=0.0):
        v = v.astype(f32).reshape(1, -1)
        return jnp.pad(v, ((0, 0), (0, lanes - v.shape[1])), constant_values=fill)

    y1h_pack = (jnp.arange(c_cls)[:, None] == y[None, :]).astype(f32)   # [C, N]
    vdiag = jnp.diagonal(var_chol, axis1=-2, axis2=-1)                   # [C, M]
    cmm = c_cls * m_ind * m_ind
    chol_rows = -(-cmm // lanes)
    vc_flat = jnp.pad(var_chol.astype(f32).reshape(-1),
                      (0, chol_rows * lanes - cmm))
    n_rows = 4 + chol_rows
    small_rows = ((n_rows + 7) // 8) * 8
    small_slab = jnp.concatenate(
        [_row(mean),                      # row 0: mean, class-major packed
         _row(y1h_pack),                  # row 1: one-hot(y), class-major packed
         _row(var_mean),                  # row 2: var_mean flat
         _row(vdiag, fill=1.0),           # row 3: Cholesky diag flat (log-safe pad)
         vc_flat.reshape(chol_rows, lanes),   # rows 4..: var_chol flat
         jnp.zeros((small_rows - n_rows, lanes), f32)], axis=0)

    kernel = functools.partial(_fused_elbo_kernel,
                               n_samp=n_samp, c_cls=c_cls, n_pts=n_pts,
                               m_ind=m_ind, chol_rows=chol_rows,
                               num_data=float(num_data), beta=float(beta))

    out = pl.pallas_call(
        kernel,
        grid=(1,),
        in_specs=[
            pl.BlockSpec((small_rows, lanes), lambda i: (0, 0)),
            pl.BlockSpec((n_samp + cn, cn), lambda i: (0, 0)),
        ],
        out_specs=pl.BlockSpec((_OUT_ROWS, lanes), lambda i: (0, 0)),
        out_shape=jax.ShapeDtypeStruct((_OUT_ROWS, lanes), jnp.float32),
        compiler_params=pltpu.CompilerParams(dimension_semantics=("arbitrary",)),
    )(small_slab, mat_slab)

    loss = out[0, 0]
    log_likelihood = out[0, 1]
    kl_divergence = out[0, 2]
    y_score = out[1, :n_pts]
    y_out = out[2, :n_pts].astype(jnp.int32)

    # TODO(synk): mll.model.added_loss_terms() and mll.named_priors() walk the
    # gpytorch module graph; no priors / added-loss terms in this synthetic
    # setup, so both contributions are exactly zero.
    log_prior = jnp.zeros_like(log_likelihood)

    if combine_terms:
        return loss, y_out, y_score
    else:
        return log_likelihood, kl_divergence, log_prior, y_out, y_score


# ---------------------------------------------------------------------------
# Pure-JAX reference (for correctness check)
# ---------------------------------------------------------------------------
def _reference(mean, scale_tril, eps, y, var_mean, var_chol, num_data, beta):
    f = mean[None] + jnp.einsum('cij,scj->sci', scale_tril, eps,
                                precision='highest')
    logits = jnp.transpose(f, (0, 2, 1))                       # [S, N, C]
    logp = jax.nn.log_softmax(logits, -1)
    probs = jax.nn.softmax(logits, -1)
    mp = probs.mean(0)
    y_out = jnp.argmax(mp, -1)
    y_score = jnp.max(mp, -1)
    res = jnp.take_along_axis(logp, y[None, :, None], axis=-1)[..., 0].mean(0).sum()
    ll = res / mean.shape[1]
    trS = jnp.sum(var_chol ** 2)
    msq = jnp.sum(var_mean ** 2)
    logdet = 2.0 * jnp.sum(jnp.log(jnp.diagonal(var_chol, axis1=-2, axis2=-1)))
    kl = 0.5 * (trS + msq - var_mean.size - logdet) / (num_data / beta)
    return -(ll - kl), y_out, y_score


if __name__ == "__main__":
    key = jax.random.PRNGKey(0)
    k1, k2, k3, k4, k5, k6 = jax.random.split(key, 6)

    # latent GP "output": mean [C, N], lower-triangular scale_tril [C, N, N]
    mean = 0.5 * jax.random.normal(k1, (C, N), jnp.float32)
    a = jax.random.normal(k2, (C, N, N), jnp.float32)
    scale_tril = jnp.tril(a, -1) * 0.1 + 0.5 * jnp.eye(N, dtype=jnp.float32)[None]

    # deterministic standard-normal draws standing in for _draw_likelihood_samples
    eps = jax.random.normal(k3, (S, C, N), jnp.float32)

    # integer class labels
    y = jax.random.randint(k4, (N,), 0, C, jnp.int32)

    # variational distribution q(u) = N(var_mean, var_chol var_chol^T), per class
    var_mean = 0.3 * jax.random.normal(k5, (C, M), jnp.float32)
    av = jax.random.normal(k6, (C, M, M), jnp.float32)
    var_chol = jnp.tril(av, -1) * 0.1 + 0.8 * jnp.eye(M, dtype=jnp.float32)[None]

    loss, y_out, y_score = dice_bce_variational_elbo(
        mean, scale_tril, eps, y, var_mean, var_chol)
    jax.block_until_ready((loss, y_out, y_score))

    ref_loss, ref_y_out, ref_y_score = _reference(
        mean, scale_tril, eps, y, var_mean, var_chol, NUM_DATA, BETA)

    np.testing.assert_allclose(np.asarray(loss), np.asarray(ref_loss),
                               rtol=1e-4, atol=1e-5)
    np.testing.assert_array_equal(np.asarray(y_out), np.asarray(ref_y_out))
    np.testing.assert_allclose(np.asarray(y_score), np.asarray(ref_y_score),
                               rtol=1e-4, atol=1e-6)

    print("KERNEL_OK")
</pallas_src>

<mosaic_0001>
module attributes {stable_mosaic.version = 11 : i64} {
  func.func @_fused_elbo_kernel(%arg0: i32, %arg1: memref<8x128xf32, #tpu.memory_space<vmem>>, %arg2: memref<72x64xf32, #tpu.memory_space<vmem>>, %arg3: memref<8x128xf32, #tpu.memory_space<vmem>>) attributes {dimension_semantics = [#tpu.dimension_semantics<arbitrary>], iteration_bounds = array<i64: 1>, scalar_prefetch = 0 : i64, scratch_operands = 0 : i64, tpu.core_type = #tpu.core_type<tc>, window_params = [{pipeline_mode = #tpu.pipeline_mode<synchronous>, transform_indices = @transform_0, window_bounds = array<i64: 8, 128>}, {pipeline_mode = #tpu.pipeline_mode<synchronous>, transform_indices = @transform_1, window_bounds = array<i64: 72, 64>}, {pipeline_mode = #tpu.pipeline_mode<synchronous>, transform_indices = @transform_2, window_bounds = array<i64: 8, 128>}]} {
    %c0 = arith.constant 0 : index
    %c0_0 = arith.constant 0 : index
    %0 = vector.load %arg2[%c0, %c0_0] : memref<72x64xf32, #tpu.memory_space<vmem>>, vector<8x64xf32>
    %c8 = arith.constant 8 : index
    %c0_1 = arith.constant 0 : index
    %1 = vector.load %arg2[%c8, %c0_1] : memref<72x64xf32, #tpu.memory_space<vmem>>, vector<64x64xf32>
    %c0_2 = arith.constant 0 : index
    %c0_3 = arith.constant 0 : index
    %2 = vector.load %arg1[%c0_2, %c0_3] : memref<8x128xf32, #tpu.memory_space<vmem>>, vector<1x64xf32>
    %c1 = arith.constant 1 : index
    %c0_4 = arith.constant 0 : index
    %3 = vector.load %arg1[%c1, %c0_4] : memref<8x128xf32, #tpu.memory_space<vmem>>, vector<1x64xf32>
    %cst = arith.constant dense<0.000000e+00> : vector<8x64xf32>
    %4 = tpu.matmul %0, %1, %cst {dimension_numbers = #tpu.dot_dimension_numbers<[1], [0], [0], [1], [0, 0, 1, 1], [], []>, precision = #tpu.contract_precision<fp32>} : vector<8x64xf32>, vector<64x64xf32>, vector<8x64xf32> -> vector<8x64xf32>
    %5 = vector.broadcast %2 : vector<1x64xf32> to vector<8x64xf32>
    %6 = arith.addf %5, %4 : vector<8x64xf32>
    %7 = vector.extract_strided_slice %6 {offsets = [0, 0], sizes = [8, 16], strides = [1, 1]} : vector<8x64xf32> to vector<8x16xf32>
    %8 = vector.extract_strided_slice %6 {offsets = [0, 16], sizes = [8, 16], strides = [1, 1]} : vector<8x64xf32> to vector<8x16xf32>
    %9 = arith.maximumf %7, %8 : vector<8x16xf32>
    %10 = vector.extract_strided_slice %6 {offsets = [0, 32], sizes = [8, 16], strides = [1, 1]} : vector<8x64xf32> to vector<8x16xf32>
    %11 = arith.maximumf %9, %10 : vector<8x16xf32>
    %12 = vector.extract_strided_slice %6 {offsets = [0, 48], sizes = [8, 16], strides = [1, 1]} : vector<8x64xf32> to vector<8x16xf32>
    %13 = arith.maximumf %11, %12 : vector<8x16xf32>
    %14 = tpu.concatenate %13, %13, %13, %13 in 1 : vector<8x16xf32>, vector<8x16xf32>, vector<8x16xf32>, vector<8x16xf32> -> vector<8x64xf32>
    %15 = arith.subf %6, %14 : vector<8x64xf32>
    %16 = math.exp %15 : vector<8x64xf32>
    %17 = vector.extract_strided_slice %16 {offsets = [0, 0], sizes = [8, 16], strides = [1, 1]} : vector<8x64xf32> to vector<8x16xf32>
    %18 = vector.extract_strided_slice %16 {offsets = [0, 16], sizes = [8, 16], strides = [1, 1]} : vector<8x64xf32> to vector<8x16xf32>
    %19 = arith.addf %17, %18 : vector<8x16xf32>
    %20 = vector.extract_strided_slice %16 {offsets = [0, 32], sizes = [8, 16], strides = [1, 1]} : vector<8x64xf32> to vector<8x16xf32>
    %21 = arith.addf %19, %20 : vector<8x16xf32>
    %22 = vector.extract_strided_slice %16 {offsets = [0, 48], sizes = [8, 16], strides = [1, 1]} : vector<8x64xf32> to vector<8x16xf32>
    %23 = arith.addf %21, %22 : vector<8x16xf32>
    %24 = math.log %23 : vector<8x16xf32>
    %cst_5 = arith.constant 1.000000e+00 : f32
    %25 = vector.broadcast %cst_5 : f32 to vector<8x16xf32>
    %26 = arith.divf %25, %23 : vector<8x16xf32>
    %27 = vector.extract_strided_slice %16 {offsets = [0, 0], sizes = [8, 16], strides = [1, 1]} : vector<8x64xf32> to vector<8x16xf32>
    %28 = arith.mulf %27, %26 : vector<8x16xf32>
    %cst_6 = arith.constant dense<0.000000e+00> : vector<16xf32>
    %29 = vector.multi_reduction <add>, %28, %cst_6 [0] : vector<8x16xf32> to vector<16xf32>
    %30 = vector.shape_cast %29 : vector<16xf32> to vector<1x16xf32>
    %cst_7 = arith.constant 1.250000e-01 : f32
    %31 = vector.broadcast %cst_7 : f32 to vector<1x16xf32>
    %32 = arith.mulf %30, %31 : vector<1x16xf32>
    %cst_8 = arith.constant 0.000000e+00 : f32
    %33 = vector.broadcast %cst_8 : f32 to vector<1x16xf32>
    %34 = vector.extract_strided_slice %16 {offsets = [0, 16], sizes = [8, 16], strides = [1, 1]} : vector<8x64xf32> to vector<8x16xf32>
    %35 = arith.mulf %34, %26 : vector<8x16xf32>
    %cst_9 = arith.constant dense<0.000000e+00> : vector<16xf32>
    %36 = vector.multi_reduction <add>, %35, %cst_9 [0] : vector<8x16xf32> to vector<16xf32>
    %37 = vector.shape_cast %36 : vector<16xf32> to vector<1x16xf32>
    %cst_10 = arith.constant 1.250000e-01 : f32
    %38 = vector.broadcast %cst_10 : f32 to vector<1x16xf32>
    %39 = arith.mulf %37, %38 : vector<1x16xf32>
    %40 = arith.cmpf ogt, %39, %32 : vector<1x16xf32>
    %cst_11 = arith.constant 1.000000e+00 : f32
    %41 = vector.broadcast %cst_11 : f32 to vector<1x16xf32>
    %42 = arith.select %40, %41, %33 : vector<1x16xi1>, vector<1x16xf32>
    %43 = arith.select %40, %39, %32 : vector<1x16xi1>, vector<1x16xf32>
    %44 = vector.extract_strided_slice %16 {offsets = [0, 32], sizes = [8, 16], strides = [1, 1]} : vector<8x64xf32> to vector<8x16xf32>
    %45 = arith.mulf %44, %26 : vector<8x16xf32>
    %cst_12 = arith.constant dense<0.000000e+00> : vector<16xf32>
    %46 = vector.multi_reduction <add>, %45, %cst_12 [0] : vector<8x16xf32> to vector<16xf32>
    %47 = vector.shape_cast %46 : vector<16xf32> to vector<1x16xf32>
    %cst_13 = arith.constant 1.250000e-01 : f32
    %48 = vector.broadcast %cst_13 : f32 to vector<1x16xf32>
    %49 = arith.mulf %47, %48 : vector<1x16xf32>
    %50 = arith.cmpf ogt, %49, %43 : vector<1x16xf32>
    %cst_14 = arith.constant 2.000000e+00 : f32
    %51 = vector.broadcast %cst_14 : f32 to vector<1x16xf32>
    %52 = arith.select %50, %51, %42 : vector<1x16xi1>, vector<1x16xf32>
    %53 = arith.select %50, %49, %43 : vector<1x16xi1>, vector<1x16xf32>
    %54 = vector.extract_strided_slice %16 {offsets = [0, 48], sizes = [8, 16], strides = [1, 1]} : vector<8x64xf32> to vector<8x16xf32>
    %55 = arith.mulf %54, %26 : vector<8x16xf32>
    %cst_15 = arith.constant dense<0.000000e+00> : vector<16xf32>
    %56 = vector.multi_reduction <add>, %55, %cst_15 [0] : vector<8x16xf32> to vector<16xf32>
    %57 = vector.shape_cast %56 : vector<16xf32> to vector<1x16xf32>
    %cst_16 = arith.constant 1.250000e-01 : f32
    %58 = vector.broadcast %cst_16 : f32 to vector<1x16xf32>
    %59 = arith.mulf %57, %58 : vector<1x16xf32>
    %60 = arith.cmpf ogt, %59, %53 : vector<1x16xf32>
    %cst_17 = arith.constant 3.000000e+00 : f32
    %61 = vector.broadcast %cst_17 : f32 to vector<1x16xf32>
    %62 = arith.select %60, %61, %52 : vector<1x16xi1>, vector<1x16xf32>
    %63 = arith.select %60, %59, %53 : vector<1x16xi1>, vector<1x16xf32>
    %64 = vector.broadcast %3 : vector<1x64xf32> to vector<8x64xf32>
    %65 = arith.mulf %15, %64 : vector<8x64xf32>
    %66 = vector.shape_cast %65 : vector<8x64xf32> to vector<1x8x64xf32>
    %cst_18 = arith.constant dense<0.000000e+00> : vector<1xf32>
    %67 = vector.multi_reduction <add>, %66, %cst_18 [1, 2] : vector<1x8x64xf32> to vector<1xf32>
    %68 = vector.shape_cast %67 : vector<1xf32> to vector<1x1x1xf32>
    %69 = vector.extract %68[0, 0, 0] : f32 from vector<1x1x1xf32>
    %70 = vector.shape_cast %24 : vector<8x16xf32> to vector<1x8x16xf32>
    %cst_19 = arith.constant dense<0.000000e+00> : vector<1xf32>
    %71 = vector.multi_reduction <add>, %70, %cst_19 [1, 2] : vector<1x8x16xf32> to vector<1xf32>
    %72 = vector.shape_cast %71 : vector<1xf32> to vector<1x1x1xf32>
    %73 = vector.extract %72[0, 0, 0] : f32 from vector<1x1x1xf32>
    %74 = arith.subf %69, %73 : f32
    %cst_20 = arith.constant 1.250000e-01 : f32
    %75 = arith.mulf %74, %cst_20 : f32
    %cst_21 = arith.constant 1.600000e+01 : f32
    %76 = arith.divf %75, %cst_21 : f32
    %c2 = arith.constant 2 : index
    %c0_22 = arith.constant 0 : index
    %77 = vector.load %arg1[%c2, %c0_22] : memref<8x128xf32, #tpu.memory_space<vmem>>, vector<1x32xf32>
    %c3 = arith.constant 3 : index
    %c0_23 = arith.constant 0 : index
    %78 = vector.load %arg1[%c3, %c0_23] : memref<8x128xf32, #tpu.memory_space<vmem>>, vector<1x32xf32>
    %c4 = arith.constant 4 : index
    %c0_24 = arith.constant 0 : index
    %79 = vector.load %arg1[%c4, %c0_24] : memref<8x128xf32, #tpu.memory_space<vmem>>, vector<2x128xf32>
    %80 = arith.mulf %79, %79 : vector<2x128xf32>
    %81 = vector.shape_cast %80 : vector<2x128xf32> to vector<1x2x128xf32>
    %cst_25 = arith.constant dense<0.000000e+00> : vector<1xf32>
    %82 = vector.multi_reduction <add>, %81, %cst_25 [1, 2] : vector<1x2x128xf32> to vector<1xf32>
    %83 = vector.shape_cast %82 : vector<1xf32> to vector<1x1x1xf32>
    %84 = vector.extract %83[0, 0, 0] : f32 from vector<1x1x1xf32>
    %85 = arith.mulf %77, %77 : vector<1x32xf32>
    %86 = vector.shape_cast %85 : vector<1x32xf32> to vector<1x1x32xf32>
    %cst_26 = arith.constant dense<0.000000e+00> : vector<1xf32>
    %87 = vector.multi_reduction <add>, %86, %cst_26 [1, 2] : vector<1x1x32xf32> to vector<1xf32>
    %88 = vector.shape_cast %87 : vector<1xf32> to vector<1x1x1xf32>
    %89 = vector.extract %88[0, 0, 0] : f32 from vector<1x1x1xf32>
    %90 = math.log %78 : vector<1x32xf32>
    %91 = vector.shape_cast %90 : vector<1x32xf32> to vector<1x1x32xf32>
    %cst_27 = arith.constant dense<0.000000e+00> : vector<1xf32>
    %92 = vector.multi_reduction <add>, %91, %cst_27 [1, 2] : vector<1x1x32xf32> to vector<1xf32>
    %93 = vector.shape_cast %92 : vector<1xf32> to vector<1x1x1xf32>
    %94 = vector.extract %93[0, 0, 0] : f32 from vector<1x1x1xf32>
    %cst_28 = arith.constant 2.000000e+00 : f32
    %95 = arith.mulf %cst_28, %94 : f32
    %96 = arith.addf %84, %89 : f32
    %cst_29 = arith.constant 3.200000e+01 : f32
    %97 = arith.subf %96, %cst_29 : f32
    %98 = arith.subf %97, %95 : f32
    %cst_30 = arith.constant 5.000000e-01 : f32
    %99 = arith.mulf %cst_30, %98 : f32
    %cst_31 = arith.constant 1.000000e+02 : f32
    %100 = arith.divf %99, %cst_31 : f32
    %101 = arith.subf %76, %100 : f32
    %cst_32 = arith.constant 0.000000e+00 : f32
    %102 = arith.subf %cst_32, %101 : f32
    %103 = tpu.iota {dimensions = array<i32: 1>} : vector<1x128xi32>
    %c0_i32 = arith.constant 0 : i32
    %104 = vector.broadcast %c0_i32 : i32 to vector<1x128xi32>
    %105 = arith.cmpi eq, %103, %104 : vector<1x128xi32>
    %c1_i32 = arith.constant 1 : i32
    %106 = vector.broadcast %c1_i32 : i32 to vector<1x128xi32>
    %107 = arith.cmpi eq, %103, %106 : vector<1x128xi32>
    %c2_i32 = arith.constant 2 : i32
    %108 = vector.broadcast %c2_i32 : i32 to vector<1x128xi32>
    %109 = arith.cmpi eq, %103, %108 : vector<1x128xi32>
    %cst_33 = arith.constant 0.000000e+00 : f32
    %110 = vector.broadcast %100 : f32 to vector<1x128xf32>
    %111 = vector.broadcast %cst_33 : f32 to vector<1x128xf32>
    %112 = arith.select %109, %110, %111 : vector<1x128xi1>, vector<1x128xf32>
    %113 = vector.broadcast %76 : f32 to vector<1x128xf32>
    %114 = arith.select %107, %113, %112 : vector<1x128xi1>, vector<1x128xf32>
    %115 = vector.broadcast %102 : f32 to vector<1x128xf32>
    %116 = arith.select %105, %115, %114 : vector<1x128xi1>, vector<1x128xf32>
    %cst_34 = arith.constant 0.000000e+00 : f32
    %117 = vector.broadcast %cst_34 : f32 to vector<1x112xf32>
    %118 = tpu.concatenate %63, %117 in 1 : vector<1x16xf32>, vector<1x112xf32> -> vector<1x128xf32>
    %119 = tpu.concatenate %62, %117 in 1 : vector<1x16xf32>, vector<1x112xf32> -> vector<1x128xf32>
    %cst_35 = arith.constant 0.000000e+00 : f32
    %120 = vector.broadcast %cst_35 : f32 to vector<5x128xf32>
    %121 = tpu.concatenate %116, %118, %119, %120 in 0 : vector<1x128xf32>, vector<1x128xf32>, vector<1x128xf32>, vector<5x128xf32> -> vector<8x128xf32>
    %c0_36 = arith.constant 0 : index
    %c0_37 = arith.constant 0 : index
    %122 = vector.load %arg3[%c0_36, %c0_37] : memref<8x128xf32, #tpu.memory_space<vmem>>, vector<8x128xf32>
    tpu.vector_store %arg3[%c0_36, %c0_37], %121 {strides = array<i32>} : memref<8x128xf32, #tpu.memory_space<vmem>>, vector<8x128xf32>,
    return
  }
  func.func @transform_0(%arg0: i32) -> (i32, i32) {
    %c0_i32 = arith.constant 0 : i32
    %c0_i32_0 = arith.constant 0 : i32
    %c0_i32_1 = arith.constant 0 : i32
    return %c0_i32, %c0_i32_0 : i32, i32
  }
  func.func @transform_1(%arg0: i32) -> (i32, i32) {
    %c0_i32 = arith.constant 0 : i32
    %c0_i32_0 = arith.constant 0 : i32
    %c0_i32_1 = arith.constant 0 : i32
    return %c0_i32, %c0_i32_0 : i32, i32
  }
  func.func @transform_2(%arg0: i32) -> (i32, i32) {
    %c0_i32 = arith.constant 0 : i32
    %c0_i32_0 = arith.constant 0 : i32
    %c0_i32_1 = arith.constant 0 : i32
    return %c0_i32, %c0_i32_0 : i32, i32
  }
}

</mosaic_0001>

<bundles_post_ra>
// kernel: tpu_custom_call.1
= control target key start
LH: loop header
LB: loop body
LE: loop exit
PB: predicated region body
PF: predicated region fallthrough
CT: control target
= control target key end

     0   :  { %v1117_v3 = vmov 0.0|0.0   ;;  %vm1118_vm0 = vmmov 0   ;;  %v1119_v14 = vmov 0.0   ;;  %s1364_s0 = inlined_call_operand.vmem [shape: f32[8,128], index: 0, kind: input, shape index: {}]   ;;  %s1365_s1 = inlined_call_operand.vmem [shape: f32[72,64], index: 1, kind: input, shape index: {}]   ;;  %s1366_s2 = inlined_call_operand.hbm [shape: f32[8,128], index: 2, kind: output, shape index: {}]  }
   0x1   :  { %v13_v0 = vld [vmem:[%s1365_s1 + $0x8] sm:$0xff]  ;;  %v14_v1 = vld [vmem:[%s1365_s1 + $0x10] sm:$0xff]  ;;  %v15_v2 = vld [vmem:[%s1365_s1 + $0x18] sm:$0xff]  ;;  %993 = vmatprep.subr.bf16.mxu0 %v1117_v3  ;;  %1005 = vmatprep.subr.bf16.mxu1 %v1117_v3 }
   0x2   :  { %v28_v4 = vand.u32 4294901760, %v13_v0  ;;  %v31_v5 = vand.u32 4294901760, %v14_v1  ;;  %v16_v6 = vld [vmem:[%s1365_s1 + $0x20] sm:$0xff]  ;;  %v34_v7 = vand.u32 4294901760, %v15_v2  ;;  %v17_v8 = vld [vmem:[%s1365_s1 + $0x28] sm:$0xff]  ;;  %v18_v9 = vld [vmem:[%s1365_s1 + $0x30] sm:$0xff]  ;;  %895 = vmatprep.mubr.msk.f32.mxu0 %vm1118_vm0, %v1119_v14  ;;  %914 = vmatprep.mubr.msk.f32.mxu1 %vm1118_vm0, %v1119_v14 }
   0x3   :  { %v37_v10 = vand.u32 4294901760, %v16_v6  ;;  %v40_v11 = vand.u32 4294901760, %v17_v8  ;;  %v43_v12 = vand.u32 4294901760, %v18_v9  ;;  %v19_v13 = vld [vmem:[%s1365_s1 + $0x38] sm:$0xff]  ;;  %v20_v19 = vld [vmem:[%s1365_s1 + $0x40] sm:$0xff] }
   0x4   :  { %v1169_v15 = vpack.c.bf16 %v31_v5, %v28_v4  ;;  %v1171_v16 = vsub.f32 %v13_v0, %v28_v4  ;;  %v1173_v17 = vsub.f32 %v14_v1, %v31_v5  ;;  %v1175_v18 = vsub.f32 %v15_v2, %v34_v7 }
   0x5   :  { %7 = vsyncpa [#allocation3], 0  ;;  %v1180_v20 = vpack.c.bf16 %v37_v10, %v34_v7  ;;  %v1182_v21 = vsub.f32 %v16_v6, %v37_v10  ;;  %v1184_v22 = vsub.f32 %v17_v8, %v40_v11  ;;  %v12_v23 = vld [vmem:[%s1365_s1] sm:$0xff]  ;;  %v1190_v24 = vsub.f32 %v18_v9, %v43_v12  ;;  %s1120_s28 = smov 80   ;;  %s1121_s29 = smov 112  }
   0x6   :  { %995 = vmatpush3.bf16.msra.mxu0 %v1169_v15  ;;  %v113_v25 = vand.u32 4294901760, %v1171_v16  ;;  %v120_v26 = vand.u32 4294901760, %v1173_v17  ;;  %v46_v27 = vand.u32 4294901760, %v19_v13  ;;  %v49_v28 = vand.u32 4294901760, %v20_v19  ;;  %s1122_s30 = smov 96   ;;  %s1123_s3 = smov 32  }
   0x7   :  { %996 = vmatprep.subr.bf16.mxu0 %v1117_v3  ;;  %v127_v29 = vand.u32 4294901760, %v1175_v18  ;;  %v134_v30 = vand.u32 4294901760, %v1182_v21  ;;  %vm23_vm1 = vcmask 523264   ;;  %v1206_v35 = vpack.c.bf16 %v43_v12, %v40_v11  ;;  %s1124_s4 = smov 16   ;;  %s1125_s5 = smov 48  }
   0x8   :  { %v114_v31 = vsub.f32 %v1171_v16, %v113_v25  ;;  %v121_v32 = vsub.f32 %v1173_v17, %v120_v26  ;;  %v1203_v33 = vsub.f32 %v19_v13, %v46_v27  ;;  %v25_v34 = vsel %vm23_vm1, %v12_v23, 0 }
   0x9   :  { %v1208_v36 = vsub.f32 %v20_v19, %v49_v28  ;;  %v128_v37 = vsub.f32 %v1175_v18, %v127_v29  ;;  %v135_v38 = vsub.f32 %v1182_v21, %v134_v30  ;;  %v1217_v41 = vand.u32 4294901760, %v25_v34 }
   0xa   :  { %998 = vmatpush3.bf16.msra.mxu0 %v1180_v20  ;;  %v115_v39 = vand.u32 4294901760, %v114_v31  ;;  %v122_v40 = vand.u32 4294901760, %v121_v32  ;;  %v141_v42 = vand.u32 4294901760, %v1184_v22  ;;  %v148_v45 = vand.u32 4294901760, %v1190_v24 }
   0xb   :  { %999 = vmatprep.subr.bf16.mxu0 %v1117_v3  ;;  %v129_v43 = vand.u32 4294901760, %v128_v37  ;;  %v136_v44 = vand.u32 4294901760, %v135_v38  ;;  %v1223_v47 = vsub.f32 %v25_v34, %v1217_v41  ;;  %v155_v49 = vand.u32 4294901760, %v1203_v33 }
   0xc   :  { %v1006_v46 = vpack.c.bf16 %v122_v40, %v115_v39  ;;  %v142_v48 = vsub.f32 %v1184_v22, %v141_v42  ;;  %v1229_v50 = vpack.c.bf16 %v49_v28, %v46_v27  ;;  %v149_v51 = vsub.f32 %v1190_v24, %v148_v45 }
   0xd   :  { %v162_v52 = vand.u32 4294901760, %v1208_v36  ;;  %v1009_v53 = vpack.c.bf16 %v136_v44, %v129_v43  ;;  %v102_v54 = vand.u32 4294901760, %v1223_v47  ;;  %v156_v56 = vsub.f32 %v1203_v33, %v155_v49 }
   0xe   :  { %1001 = vmatpush3.bf16.msra.mxu0 %v1206_v35  ;;  %1007 = vmatpush3.bf16.msra.mxu1 %v1006_v46  ;;  %v143_v55 = vand.u32 4294901760, %v142_v48  ;;  %v150_v57 = vand.u32 4294901760, %v149_v51  ;;  %v1018_v60 = vpack.c.bf16 %v1173_v17, %v1171_v16  ;;  %v1021_v2 = vpack.c.bf16 %v1182_v21, %v1175_v18 }
   0xf   :  { %1002 = vmatprep.subr.bf16.mxu0 %v1117_v3  ;;  %1008 = vmatprep.subr.bf16.mxu1 %v1117_v3  ;;  %v163_v58 = vsub.f32 %v1208_v36, %v162_v52  ;;  %v103_v59 = vsub.f32 %v1223_v47, %v102_v54  ;;  %v157_v63 = vand.u32 4294901760, %v156_v56  ;;  %v1024_v4 = vpack.c.bf16 %v1190_v24, %v1184_v22 }
  0x10   :  { %v1012_v62 = vpack.c.bf16 %v150_v57, %v143_v55  ;;  %v1027_v5 = vpack.c.bf16 %v1208_v36, %v1203_v33  ;;  %v1042_v6 = vpack.c.bf16 %v120_v26, %v113_v25  ;;  %v1045_v7 = vpack.c.bf16 %v134_v30, %v127_v29 }
  0x11   :  { %v104_v61 = vand.u32 4294901760, %v103_v59  ;;  %v164_v0 = vand.u32 4294901760, %v163_v58  ;;  %v1048_v8 = vpack.c.bf16 %v148_v45, %v141_v42  ;;  %v1051_v9 = vpack.c.bf16 %v162_v52, %v155_v49 }
  0x12   :  { %1004 = vmatpush3.bf16.msra.mxu0 %v1229_v50  ;;  %1010 = vmatpush3.bf16.msra.mxu1 %v1009_v53  ;;  %vm592_vm2 = vcmask 130048   ;;  %vm594_vm3 = vcmask 261120   ;;  %vm596_vm4 = vcmask 392192   ;;  %vm632_vm5 = vcmask 261248  }
  0x13   :  { %1011 = vmatprep.subr.bf16.mxu1 %v1117_v3  ;;  %1017 = vmatprep.subr.bf16.mxu0 %v1117_v3  ;;  %v1015_v1 = vpack.c.bf16 %v164_v0, %v157_v63  ;;  %vm730_vm7 = vcmask 1041408   ;;  %vm742_vm8 = vcmask 253952   ;;  %vm652_vm9 = vcmask 392448  }
  0x14   :  { %vm676_vm11 = vcmask 523648  }
  0x15   :  { %896 = vmatmul.mubr.f32.vlgmr.msra.gmra.mrb[0].mxu0 %v104_v61 }
  0x16   :  { %1013 = vmatpush3.bf16.msra.mxu1 %v1012_v62  ;;  %1019 = vmatpush3.bf16.msra.mxu0 %v1018_v60  ;;  %v823_v60 = vld [vmem:[%s1364_s0 + $0x1] ss:$0 sm:$0xff] }
  0x17   :  { %1014 = vmatprep.subr.bf16.mxu1 %v1117_v3  ;;  %1020 = vmatprep.subr.bf16.mxu0 %v1117_v3 }
  0x18   :  { %933 = vmatprep.mubr.msk.f32.mxu0 %vm1118_vm0, %v1119_v14 }
  0x1a   :  { %1016 = vmatpush3.bf16.msra.mxu1 %v1015_v1  ;;  %1022 = vmatpush3.bf16.msra.mxu0 %v1021_v2 }
  0x1b   :  { %1023 = vmatprep.subr.bf16.mxu0 %v1117_v3  ;;  %1029 = vmatprep.subr.bf16.mxu1 %v1117_v3 }
  0x1d   :  { %915 = vmatmul.mubr.f32.vlgmr.msra.gmra.mrb[0].mxu1 %v1217_v41 }
  0x1e   :  { %1025 = vmatpush3.bf16.msra.mxu0 %v1024_v4  ;;  %1031 = vmatpush3.bf16.msra.mxu1 %v1169_v15 }
  0x1f   :  { %1026 = vmatprep.subr.bf16.mxu0 %v1117_v3  ;;  %1032 = vmatprep.subr.bf16.mxu1 %v1117_v3 }
  0x20   :  { %952 = vmatprep.mubr.msk.f32.mxu1 %vm1118_vm0, %v1119_v14 }
  0x22   :  { %1028 = vmatpush3.bf16.msra.mxu0 %v1027_v5  ;;  %1034 = vmatpush3.bf16.msra.mxu1 %v1180_v20 }
  0x23   :  { %1035 = vmatprep.subr.bf16.mxu1 %v1117_v3  ;;  %1041 = vmatprep.subr.bf16.mxu0 %v1117_v3 }
  0x25   :  { %934 = vmatmul.mubr.f32.vlgmr.msra.gmra.mrb[2].mxu0 %v1223_v47 }
  0x26   :  { %1037 = vmatpush3.bf16.msra.mxu1 %v1206_v35  ;;  %1043 = vmatpush3.bf16.msra.mxu0 %v1042_v6 }
  0x27   :  { %1038 = vmatprep.subr.bf16.mxu1 %v1117_v3  ;;  %1044 = vmatprep.subr.bf16.mxu0 %v1117_v3 }
  0x28   :  { %971 = vmatprep.mubr.msk.f32.mxu0 %vm1118_vm0, %v1119_v14 }
  0x2a   :  { %1040 = vmatpush3.bf16.msra.mxu1 %v1229_v50  ;;  %1046 = vmatpush3.bf16.msra.mxu0 %v1045_v7 }
  0x2b   :  { %1047 = vmatprep.subr.bf16.mxu0 %v1117_v3  ;;  %1053 = vmatprep.subr.bf16.mxu1 %v1117_v3 }
  0x2d   :  { %953 = vmatmul.mubr.f32.vlgmr.msra.gmra.mrb[2].mxu1 %v102_v54 }
  0x2e   :  { %1049 = vmatpush3.bf16.msra.mxu0 %v1048_v8  ;;  %1055 = vmatpush3.bf16.msra.mxu1 %v1169_v15 }
  0x2f   :  { %1050 = vmatprep.subr.bf16.mxu0 %v1117_v3  ;;  %1056 = vmatprep.subr.bf16.mxu1 %v1117_v3 }
  0x30   :  { %990 = vmatprep.mubr.msk.f32.mxu1 %vm1118_vm0, %v1119_v14  ;;  %vm802_vm0 = vcmask 1040384  }
  0x32   :  { %1052 = vmatpush3.bf16.msra.mxu0 %v1051_v9  ;;  %1058 = vmatpush3.bf16.msra.mxu1 %v1180_v20 }
  0x33   :  { %1059 = vmatprep.subr.bf16.mxu1 %v1117_v3 }
  0x35   :  { %972 = vmatmul.mubr.f32.vlgmr.msra.gmra.mrb[4].mxu0 %v1217_v41 }
  0x36   :  { %1061 = vmatpush3.bf16.msra.mxu1 %v1206_v35 }
  0x37   :  { %1062 = vmatprep.subr.bf16.mxu1 %v1117_v3  ;;  %v822_v3 = vld [vmem:[%s1364_s0] ss:$0 sm:$0xff] }
  0x3a   :  { %1064 = vmatpush3.bf16.msra.mxu1 %v1229_v50 }
  0x3d   :  { %991 = vmatmul.mubr.f32.vlgmr.msra.gmra.mrb[4].mxu1 %v1217_v41 }
  0xe8   :  { %v106_v10 = vpop.f32.mrb[0].mxu0 }
  0xe9   :  { %v897_v11 = vpop.f32.mrb[1].mxu0 }
  0xf0   :  { %v217_v12 = vpop.f32.mrb[0].mxu1 }
  0xf1   :  { %v218_v13 = vadd.f32 %v217_v12, %v106_v10  ;;  %v916_v15 = vpop.f32.mrb[1].mxu1 }
  0xf2   :  { %v728_v15 = vld [vmem:[%s1364_s0 + $0x4] sm:$0x3] }
  0xf8   :  { %v305_v16 = vpop.f32.mrb[2].mxu0 }
  0xf9   :  { %v306_v17 = vadd.f32 %v305_v16, %v218_v13  ;;  %v935_v18 = vpop.f32.mrb[3].mxu0  ;;  %v727_v13 = vld [vmem:[%s1364_s0 + $0x3] sm:$0x1]  ;;  %v729_v16 = vmul.f32 %v728_v15, %v728_v15 }
  0xfb   :  { %v731_v18 = vsel %vm730_vm7, %v729_v16, 0.0 }
 0x100   :  { %v386_v19 = vpop.f32.mrb[2].mxu1 }
 0x101   :  { %v387_v20 = vadd.f32 %v386_v19, %v306_v17  ;;  %v954_v21 = vpop.f32.mrb[3].mxu1 }
 0x108   :  { %v481_v22 = vpop.f32.mrb[4].mxu0 }
 0x109   :  { %v482_v23 = vadd.f32 %v481_v22, %v387_v20  ;;  %v973_v24 = vpop.f32.mrb[5].mxu0 }
 0x110   :  { %v560_v25 = vpop.f32.mrb[4].mxu1 }
 0x111   :  { %v561_v26 = vadd.f32 %v560_v25, %v482_v23  ;;  %v992_v27 = vpop.f32.mrb[5].mxu1 }
 0x113   :  { %v568_v28 = vadd.f32 %v822_v3, %v561_v26 }
 0x115   :  { %578 = vrot.lane.b32.xlu1 %v568_v28, %s1120_s28  ;;  %570 = vrot.lane.b32.xlu0 %v568_v28, %s1121_s29 }
 0x119   :  { %574 = vrot.lane.b32.xlu0 %v568_v28, %s1122_s30 }
 0x187   :  { %v571_v29 = vpop.permute.xlu0 %570  ;;  %v579_v33 = vpop.permute.xlu1 %578 }
 0x188   :  { %v573_v30 = vmax.f32 %v568_v28, %v571_v29 }
 0x18b   :  { %v575_v31 = vpop.permute.xlu0 %574 }
 0x18c   :  { %v577_v32 = vmax.f32 %v573_v30, %v575_v31 }
 0x18e   :  { %v581_v34 = vmax.f32 %v577_v32, %v579_v33 }
 0x190   :  { %586 = vrot.lane.b32.xlu0 %v581_v34, %s1123_s3  ;;  %583 = vrot.lane.b32.xlu1 %v581_v34, %s1124_s4 }
 0x194   :  { %589 = vrot.lane.b32.xlu1 %v581_v34, %s1125_s5 }
 0x202   :  { %v584_v35 = vpop.permute.xlu1 %583  ;;  %v587_v36 = vpop.permute.xlu0 %586 }
 0x203   :  { %v593_v37 = vsel %vm592_vm2, %v581_v34, %v584_v35 }
 0x204   :  { %v595_v38 = vsel %vm594_vm3, %v593_v37, %v587_v36 }
 0x206   :  { %v590_v39 = vpop.permute.xlu1 %589 }
 0x207   :  { %v597_v40 = vsel %vm596_vm4, %v595_v38, %v590_v39 }
 0x208   :  { %v598_v41 = vsub.f32 %v568_v28, %v597_v40 }
 0x20a   :  { %v599_v42 = vmul.f32 1.442695, %v598_v41  ;;  %v700_v61 = vmul.f32 %v823_v60, %v598_v41 }
 0x20c   :  { %1085 = vpow2.f32 %v599_v42  ;;  %v701_v62 = vsel %vm23_vm1, %v700_v61, 0.0  ;;  %vm805_vm1 = vcmask 1042432  }
 0x216   :  { %v1310_v43 = vpop.eup %1085 }
 0x217   :  { %606 = vrot.lane.b32.xlu1 %v1310_v43, %s1122_s30  ;;  %602 = vrot.lane.b32.xlu0 %v1310_v43, %s1121_s29 }
 0x21b   :  { %610 = vrot.lane.b32.xlu0 %v1310_v43, %s1120_s28 }
 0x289   :  { %v603_v44 = vpop.permute.xlu0 %602  ;;  %v607_v46 = vpop.permute.xlu1 %606 }
 0x28a   :  { %v605_v45 = vadd.f32 %v1310_v43, %v603_v44 }
 0x28c   :  { %v609_v47 = vadd.f32 %v607_v46, %v605_v45 }
 0x28d   :  { %v611_v48 = vpop.permute.xlu0 %610 }
 0x28e   :  { %v613_v49 = vadd.f32 %v611_v48, %v609_v47 }
 0x290   :  { %1087 = vrcp.f32 %v613_v49 }
 0x291   :  { %1089 = vlog2.f32 %v613_v49 }
 0x292   :  { %1091 = vlog2.f32 %v727_v13 }
 0x29a   :  { %v1088_v50 = vpop.eup %1087 }
 0x29b   :  { %628 = vrot.lane.b32.xlu1 %v1088_v50, %s1124_s4  ;;  %v618_v51 = vmul.f32 %v1088_v50, %v1310_v43  ;;  %v1090_v17 = vpop.eup %1089 }
 0x29c   :  { %v1092_v20 = vpop.eup %1091  ;;  %v615_v21 = vmul.f32 0.6931472, %v1090_v17 }
 0x29d   :  { %v619_v52 = vsel %vm592_vm2, %v618_v51, 0.0  ;;  %v754_v23 = vmul.f32 0.6931472, %v1092_v20 }
 0x29e   :  { %v620_v53 = vrot.slane %v619_v52, 4  ;;  %v711_v24 = vsel %vm592_vm2, %v615_v21, 0.0 }
 0x29f   :  { %648 = vrot.lane.b32.xlu1 %v1088_v50, %s1123_s3  ;;  %v755_v3 = vsel %vm742_vm8, %v754_v23, 0.0 }
 0x2a0   :  { %v621_v54 = vadd.f32 %v620_v53, %v619_v52 }
 0x2a2   :  { %v622_v55 = vrot.slane %v621_v54, 2 }
 0x2a4   :  { %v623_v56 = vadd.f32 %v622_v55, %v621_v54 }
 0x2a6   :  { %v624_v57 = vrot.slane %v623_v56, 1 }
 0x2a8   :  { %v625_v58 = vadd.f32 %v624_v57, %v623_v56 }
 0x2aa   :  { %v626_v59 = vmul.f32 0.125, %v625_v58 }
 0x2ac   :  { %642 = vrot.lane.b32.xlu0 %v626_v59, %s1124_s4 }
 0x2cb   :  { %702 = vadd.xlane.f32.xlu0 %v701_v62 }
 0x30d   :  { %v629_v63 = vpop.permute.xlu1 %628 }
 0x30e   :  { %v631_v0 = vmul.f32 %v1310_v43, %v629_v63 }
 0x310   :  { %v633_v1 = vsel %vm632_vm5, %v631_v0, 0.0 }
 0x311   :  { %v634_v2 = vrot.slane %v633_v1, 4  ;;  %v649_v32 = vpop.permute.xlu1 %648 }
 0x312   :  { %v651_v33 = vmul.f32 %v1310_v43, %v649_v32 }
 0x313   :  { %v635_v4 = vadd.f32 %v634_v2, %v633_v1 }
 0x314   :  { %v653_v34 = vsel %vm652_vm9, %v651_v33, 0.0 }
 0x315   :  { %v636_v5 = vrot.slane %v635_v4, 2  ;;  %v654_v35 = vrot.slane %v653_v34, 4 }
 0x317   :  { %v637_v6 = vadd.f32 %v636_v5, %v635_v4  ;;  %v655_v36 = vadd.f32 %v654_v35, %v653_v34 }
 0x319   :  { %v638_v7 = vrot.slane %v637_v6, 1  ;;  %v656_v37 = vrot.slane %v655_v36, 2 }
 0x31b   :  { %v639_v8 = vadd.f32 %v638_v7, %v637_v6  ;;  %v657_v38 = vadd.f32 %v656_v37, %v655_v36 }
 0x31d   :  { %v640_v9 = vmul.f32 0.125, %v639_v8  ;;  %v658_v39 = vrot.slane %v657_v38, 1 }
 0x31e   :  { %v643_v10 = vpop.permute.xlu0 %642 }
 0x31f   :  { %vm645_vm6 = vcmp.gt.f32.partialorder %v640_v9, %v643_v10  ;;  %v659_v40 = vadd.f32 %v658_v39, %v657_v38 }
 0x320   :  { %v647_v11 = vsel %vm645_vm6, %v640_v9, %v643_v10  ;;  %v646_v12 = vsel %vm645_vm6, 1.0, %v1119_v14  ;;  %v726_v14 = vld [vmem:[%s1364_s0 + $0x2] sm:$0x1] }
 0x321   :  { %662 = vrot.lane.b32.xlu0 %v647_v11, %s1124_s4  ;;  %667 = vrot.lane.b32.xlu1 %v646_v12, %s1124_s4  ;;  %v741_v19 = vmul.f32 %v726_v14, %v726_v14  ;;  %v660_v41 = vmul.f32 0.125, %v659_v40 }
 0x323   :  { %v743_v22 = vsel %vm742_vm8, %v741_v19, 0.0 }
 0x340   :  { %732 = vadd.xlane.f32.xlu0 %v731_v18 }
 0x344   :  { %744 = vadd.xlane.f32.xlu0 %v743_v22 }
 0x345   :  { %712 = vadd.xlane.f32.xlu1 %v711_v24 }
 0x349   :  { %756 = vadd.xlane.f32.xlu1 %v755_v3 }
 0x358   :  { %v703_v25 = vpop.xlane.xlu0 %702 }
 0x359   :  { %v704_v26 = vrot.slane %v703_v25, 4 }
 0x35a   :  { %672 = vrot.lane.b32.xlu0 %v1088_v50, %s1125_s5 }
 0x35b   :  { %v705_v27 = vadd.f32 %v704_v26, %v703_v25 }
 0x35d   :  { %v706_v28 = vrot.slane %v705_v27, 2 }
 0x35f   :  { %v707_v29 = vadd.f32 %v706_v28, %v705_v27 }
 0x361   :  { %v708_v30 = vrot.slane %v707_v29, 1 }
 0x363   :  { %v709_v31 = vadd.f32 %v708_v30, %v707_v29 }
 0x365   :  { %1065 = vpush %v709_v31 }
 0x393   :  { %v663_v42 = vpop.permute.xlu0 %662  ;;  %v668_v45 = vpop.permute.xlu1 %667 }
 0x394   :  { %vm665_vm10 = vcmp.gt.f32.partialorder %v660_v41, %v663_v42 }
 0x395   :  { %v671_v44 = vsel %vm665_vm10, %v660_v41, %v663_v42  ;;  %v670_v46 = vsel %vm665_vm10, 2.0, %v668_v45 }
 0x396   :  { %686 = vrot.lane.b32.xlu1 %v671_v44, %s1124_s4  ;;  %s1066_s0 = spop %1065 }
 0x39a   :  { %691 = vrot.lane.b32.xlu1 %v670_v46, %s1124_s4 }
 0x3cd   :  { %v733_v47 = vpop.xlane.xlu0 %732 }
 0x3ce   :  { %v734_v48 = vrot.slane %v733_v47, 4 }
 0x3d0   :  { %v735_v49 = vadd.f32 %v734_v48, %v733_v47 }
 0x3d1   :  { %v745_v50 = vpop.xlane.xlu0 %744 }
 0x3d2   :  { %v736_v51 = vrot.slane %v735_v49, 2  ;;  %v746_v52 = vrot.slane %v745_v50, 4  ;;  %v713_v53 = vpop.xlane.xlu1 %712 }
 0x3d3   :  { %v714_v54 = vrot.slane %v713_v53, 4 }
 0x3d4   :  { %v747_v55 = vadd.f32 %v746_v52, %v745_v50  ;;  %v737_v56 = vadd.f32 %v736_v51, %v735_v49 }
 0x3d5   :  { %v715_v57 = vadd.f32 %v714_v54, %v713_v53  ;;  %v673_v12 = vpop.permute.xlu0 %672 }
 0x3d6   :  { %v748_v58 = vrot.slane %v747_v55, 2  ;;  %v757_v59 = vpop.xlane.xlu1 %756  ;;  %v738_v62 = vrot.slane %v737_v56, 1  ;;  %v675_v13 = vmul.f32 %v1310_v43, %v673_v12  ;;  %v775_v43 = vlaneseq }
 0x3d7   :  { %v716_v60 = vrot.slane %v715_v57, 2  ;;  %v758_v61 = vrot.slane %v757_v59, 4 }
 0x3d8   :  { %v749_v63 = vadd.f32 %v748_v58, %v747_v55  ;;  %v739_v6 = vadd.f32 %v738_v62, %v737_v56  ;;  %v677_v15 = vsel %vm676_vm11, %v675_v13, 0.0  ;;  %v776_v25 = vand.u32 127, %v775_v43 }
 0x3d9   :  { %v759_v0 = vadd.f32 %v758_v61, %v757_v59  ;;  %v717_v1 = vadd.f32 %v716_v60, %v715_v57  ;;  %v678_v16 = vrot.slane %v677_v15, 4 }
 0x3da   :  { %v750_v2 = vrot.slane %v749_v63, 1  ;;  %vm779_vm13 = vcmp.eq.s32.totalorder %v776_v25, 2  ;;  %vm778_vm14 = vcmp.eq.s32.totalorder %v776_v25, 1  ;;  %vm777_vm15 = vcmp.eq.s32.totalorder %v776_v25, 0 }
 0x3db   :  { %v760_v4 = vrot.slane %v759_v0, 2  ;;  %v718_v5 = vrot.slane %v717_v1, 1  ;;  %v679_v14 = vadd.f32 %v678_v16, %v677_v15 }
 0x3dc   :  { %v751_v8 = vadd.f32 %v750_v2, %v749_v63 }
 0x3dd   :  { %v719_v7 = vadd.f32 %v718_v5, %v717_v1  ;;  %v761_v9 = vadd.f32 %v760_v4, %v759_v0  ;;  %v680_v17 = vrot.slane %v679_v14, 2 }
 0x3df   :  { %1067 = vpush %v719_v7  ;;  %v762_v10 = vrot.slane %v761_v9, 1  ;;  %v681_v18 = vadd.f32 %v680_v17, %v679_v14 }
 0x3e0   :  { %1069 = vpush %v739_v6 }
 0x3e1   :  { %1071 = vpush %v751_v8  ;;  %v763_v11 = vadd.f32 %v762_v10, %v761_v9  ;;  %v682_v19 = vrot.slane %v681_v18, 1 }
 0x3e3   :  { %1073 = vpush %v763_v11  ;;  %v683_v20 = vadd.f32 %v682_v19, %v681_v18 }
 0x3e5   :  { %v684_v21 = vmul.f32 0.125, %v683_v20 }
 0x408   :  { %v687_v22 = vpop.permute.xlu1 %686 }
 0x409   :  { %vm689_vm12 = vcmp.gt.f32.partialorder %v684_v21, %v687_v22 }
 0x40a   :  { %v695_v23 = vsel %vm689_vm12, %v684_v21, %v687_v22 }
 0x40b   :  { %787 = vrot.lane.b32.xlu0 %v695_v23, %s1120_s28 }
 0x40c   :  { %v692_v24 = vpop.permute.xlu1 %691 }
 0x40d   :  { %v694_v3 = vsel %vm689_vm12, 3.0, %v692_v24 }
 0x40e   :  { %792 = vrot.lane.b32.xlu1 %v694_v3, %s1120_s28  ;;  %s1126_s28 = smov [#allocation2]  }
 0x40f   :  { %s814_s29 = sshll.u32 %s1126_s28, 4  ;;  %s815_s29 = int_to_ptr.vmem [resolvable:$true] %s814_s29 }
 0x410   :  { %s1068_s14 = spop %1067  ;;  %s1093_s30 = scalar_lea.vmem %s815_s29, 128 }
 0x411   :  { %s1070_s15 = spop %1069  ;;  %s721_s22 = ssub.f32 %s1066_s0, %s1068_s14 }
 0x412   :  { %s1072_s16 = spop %1071  ;;  %p1094_p0 = scmp.ne.s32.totalorder %s815_s29, %s1093_s30 }
 0x413   :  { %s766_s17 = sadd.f32 %s1072_s16, %s1070_s15  ;;  %s722_s24 = smul.f32 0.125, %s721_s22 }
 0x414   :  { %s1074_s18 = spop %1073  ;;  %p1098_p1 = scmp.lt.s32.totalorder %s815_s29, %s815_s29 }
 0x415   :  { %s824_s19 = sadd.f32 -32.0, %s766_s17  ;;  %s765_s20 = smul.f32 2.0, %s1074_s18 }
 0x416   :  { %s725_s26 = smul.f32 0.0625, %s722_s24  ;;  %p1099_p2 = scmp.lt.s32.totalorder %s1093_s30, %s1093_s30 }
 0x417   :  { %s768_s21 = ssub.f32 %s824_s19, %s765_s20 }
 0x418   :  { %v782_v32 = vstv %s725_s26  ;;  %p1100_p3 = por %p1099_p2, %p1098_p1 }
 0x419   :  { %s769_s23 = smul.f32 0.5, %s768_s21 }
 0x41a   :  { %p1101_p4 = pnand %p1100_p3, %p1094_p0 }
 0x41b   :  { %s772_s25 = smul.f32 0.01, %s769_s23 }
 0x41d   :  { %s773_s1 = ssub.f32 %s725_s26, %s772_s25  ;;  %v780_v26 = vstv %s772_s25 }
 0x41e   :  { %v781_v28 = vsel %vm779_vm13, %v780_v26, 0.0 }
 0x41f   :  { %s774_s27 = ssub.f32 0.0, %s773_s1  ;;  %v783_v34 = vsel %vm778_vm14, %v782_v32, %v781_v28 }
 0x421   :  { %v784_v30 = vstv %s774_s27 }
 0x422   :  { %v785_v37 = vsel %vm777_vm15, %v784_v30, %v783_v34 }
 0x47d   :  { %v788_v27 = vpop.permute.xlu0 %787 }
 0x47e   :  { %v790_v29 = vsel %vm592_vm2, %v788_v27, 0.0 }
 0x47f   :  { %v797_v31 = vrot.slane %v790_v29, 7 }
 0x480   :  { %v793_v33 = vpop.permute.xlu1 %792 }
 0x481   :  { %v795_v35 = vsel %vm592_vm2, %v793_v33, 0.0  ;;  %v803_v38 = vsel %vm802_vm0, %v785_v37, %v797_v31 }
 0x482   :  { %v800_v36 = vrot.slane %v795_v35, 6 }
 0x484   :  { %v804_v39 = vsel %vm730_vm7, %v803_v38, %v800_v36 }
 0x485   :  { %v806_v40 = vsel %vm805_vm1, %v804_v39, 0.0 }
 0x486   :  { %807 = vst [vmem:[#allocation2] sm:$0xff] %v806_v40 }
 0x487   :  { %1104 = shalt.err (!%p1101_p4)
}
 0x488   :  { %s1105_s5 = scalar_lea.hbm %s1366_s2, 128 }
 0x489   :  { %p1106_p5 = scmp.ne.s32.totalorder %s1366_s2, %s1105_s5  ;;  %p1109_p6 = scmp.lt.u32.totalorder %s1105_s5, %s1366_s2 }
 0x48b   :  { %p1111_p7 = pnand %p1109_p6, %p1106_p5 }
 0x48d   :  { %1114 = shalt.err (!%p1111_p7)
}
 0x48e   :  { %817 = dma.vmem_to_hbm [thread:$0]  %s815_s29, 128, %s1366_s2, [#allocation3]  }
 0x48f   :  { %1115 = dma.done.wait [#allocation3], 128  }
 0x490   :  { %1116 = vsyncadd [#allocation3], 4294967168 }
 0x491   :  { %821 = vsyncpa [#allocation3], 1 }

</bundles_post_ra>
